<compile_context>
chip_gen: v7x
topology: tpu7x:2x2x1
jax: 0.10.0
libtpu: 0.0.40
codegen_flags: <defaults>
</compile_context>

<pallas_src>
import functools

import jax
import jax.numpy as jnp
from jax.experimental import pallas as pl
from jax.experimental.pallas import tpu as pltpu


# Explicit scoped-VMEM budget: ~8.5 MiB is actually used with 2 MiB blocks, but
# v5e's default scoped limit is only 16 MiB, so set it explicitly.  32 MiB is
# safe on every generation (v7x physical VMEM is 64 MiB -> >=32 MiB headroom).
_VMEM_LIMIT_BYTES = 32 * 1024 * 1024


@functools.lru_cache(maxsize=None)
def _num_tensorcores() -> int:
    """TensorCores per chip (v7x: 2, v5e/v6e: 1).

    A wrong guess only costs one redundant (clamped, masked-out) tile fetch,
    never correctness, so fail soft to 2.
    """
    try:
        info = pltpu.get_tpu_info()
        for name in ("num_cores", "core_count", "cores_per_chip",
                     "num_tensorcores", "tensorcore_count"):
            n = getattr(info, name, None)
            if n is not None and int(n) >= 1:
                return min(int(n), 2)
    except Exception:
        pass
    return 2


def _row_tile(rows, lanes, itemsize, target_bytes=2 << 20):
    """Rows per block: ~target_bytes per input block, rounded down to the
    dtype's sublane packing multiple (8 f32 / 16 bf16 / 32 int8)."""
    itemsize = int(itemsize)
    pack = 8 * max(1, 4 // max(1, itemsize))
    if rows <= pack:
        return rows                                  # block == full dim is allowed
    tb = target_bytes // max(1, lanes * itemsize)
    tb = max(pack, min(tb, rows))
    return (tb // pack) * pack


def _cosine_row_tile(rows, lanes, itemsize, target_bytes=2 << 20):
    """Row tile for the cosine kernel: must be a multiple of 128 (the output
    block is lane-dense (1, tile)) unless it covers all rows."""
    if rows <= 128:
        return rows
    per_row = max(1, lanes * int(itemsize))
    tb = (target_bytes // per_row) // 128 * 128
    if tb >= rows:
        return rows
    return max(tb, 128)


# ----------------------------------------------------------------------------
# 'mse' / 'mae' reduction kernel.
# grid = (ncores, tiles_per_core).  Each step does a pure-VPU fold of its tile
# into a tiny (8, lanes) f32 partial; the cross-lane reduction and the
# lane-dense (8, 128) output store happen only at each core's last step.
# ----------------------------------------------------------------------------
def _reduce_loss_kernel(x_ref, y_ref, out_ref, acc_ref, *,
                        squared: bool, rows: int, tile_rows: int,
                        tiles_per_core: int):
    c = pl.program_id(0)            # TensorCore axis ("parallel")
    i = pl.program_id(1)            # row tile within this core ("arbitrary")

    @pl.when(i == 0)
    def _init():
        acc_ref[...] = jnp.zeros_like(acc_ref)

    d = x_ref[...].astype(jnp.float32) - y_ref[...].astype(jnp.float32)
    v = d * d if squared else jnp.abs(d)

    acc_rows = acc_ref.shape[0]
    groups = tile_rows // acc_rows

    def fold(u):
        # Tree of sublane-group VALU adds: (tile_rows, lanes) -> (acc_rows, lanes).
        # Static, (8,128)-aligned slices of a loaded value: pure vreg selection.
        if groups <= 1:
            return u
        parts = [u[g * acc_rows:(g + 1) * acc_rows, :] for g in range(groups)]
        while len(parts) > 1:
            nxt = [parts[k] + parts[k + 1] for k in range(0, len(parts) - 1, 2)]
            if len(parts) % 2:
                nxt.append(parts[-1])
            parts = nxt
        return parts[0]

    # Rows of this tile that are in range.  Only the last (or clamped
    # duplicate) tile of each core is ragged; all other tiles take the
    # unmasked fast path so the steady state carries no mask work.
    row_start = (c * tiles_per_core + i) * tile_rows
    rows_valid = rows - row_start            # <= 0 for fully out-of-range tiles

    @pl.when(rows_valid >= tile_rows)
    def _full_tile():
        acc_ref[...] += fold(v)

    @pl.when(rows_valid < tile_rows)
    def _ragged_tile():
        # Select (not multiply): padded / out-of-range rows may hold garbage.
        row_ids = jax.lax.broadcasted_iota(jnp.int32, v.shape, 0)
        acc_ref[...] += fold(jnp.where(row_ids < rows_valid, v, 0.0))

    @pl.when(i == pl.num_programs(1) - 1)
    def _finalize():
        s = jnp.sum(acc_ref[...])
        out_ref[...] = jnp.full(out_ref.shape, s, dtype=out_ref.dtype)


# ----------------------------------------------------------------------------
# 'cosine' kernel: per-row 1 - cos_sim along the feature (lane) axis, written
# lane-dense as a (1, tile_rows) block.  Row reductions are ones-vector
# contractions on the (otherwise idle) MXU, so the per-row results land along
# lanes with no relayout and the HBM store is unmasked.  Matches
# torch.nn.CosineSimilarity(dim=1, eps=1e-8) on 2-D inputs, then 1 - sim.
# ----------------------------------------------------------------------------
def _cosine_dir_kernel(x_ref, y_ref, out_ref):
    x = x_ref[...].astype(jnp.float32)               # (tb, D)
    y = y_ref[...].astype(jnp.float32)
    ones = jnp.ones((1, x.shape[-1]), jnp.float32)   # (1, D)
    dims = (((1,), (1,)), ((), ()))                  # contract D with D -> (1, tb)

    def row_sum(u):
        return jax.lax.dot_general(ones, u, dims,
                                   precision=jax.lax.Precision.HIGHEST,
                                   preferred_element_type=jnp.float32)

    dot = row_sum(x * y)                             # (1, tb)
    nx2 = row_sum(x * x)
    ny2 = row_sum(y * y)
    # max(||x||*||y||, eps) with eps=1e-8  ==  rsqrt with an eps^2 clamp:
    # a single EUP rsqrt instead of two sqrts + an exact reciprocal.
    sim = dot * jax.lax.rsqrt(jnp.maximum(nx2 * ny2, 1e-16))
    out_ref[...] = 1.0 - sim


def _reference_loss(x, y, loss_type):
    """Plain-jnp implementation; also the fallback for tiny inputs."""
    xf = x.astype(jnp.float32)
    yf = y.astype(jnp.float32)
    if loss_type == "mse":
        return jnp.mean((xf - yf) ** 2)
    if loss_type == "mae":
        return jnp.mean(jnp.abs(xf - yf))
    dot = jnp.sum(xf * yf, axis=1)
    nrm = jnp.linalg.norm(xf, axis=1) * jnp.linalg.norm(yf, axis=1)
    return 1.0 - dot / jnp.maximum(nrm, 1e-8)


def direction_loss(x, y, loss_type: str = "mse", *, min_pallas_bytes: int = 1 << 20):
    """Pallas implementation of DirectionLoss.forward(x, y).

    min_pallas_bytes: below this total input size, use a plain-jnp fallback
    (XLA's fused reduction beats the pallas_call fixed cost for tiny inputs).
    Pass 0 to force the Pallas kernels.
    """
    assert x.shape == y.shape, "x and y must have the same shape"
    if loss_type not in ("mse", "mae", "cosine"):
        raise ValueError(f"unknown loss_type: {loss_type}")

    total_bytes = x.size * x.dtype.itemsize + y.size * y.dtype.itemsize
    if total_bytes < min_pallas_bytes:
        return _reference_loss(x, y, loss_type)

    if loss_type in ("mse", "mae"):
        n_elem = x.size
        # Collapse leading dims (free reshape; no pad/cast copy in HBM).
        if x.ndim == 0:
            x2, y2 = x.reshape(1, 1), y.reshape(1, 1)
        else:
            x2 = x.reshape(-1, x.shape[-1])
            y2 = y.reshape(-1, y.shape[-1])
        rows, lanes = x2.shape

        tb = _row_tile(rows, lanes, x2.dtype.itemsize)
        n_blocks = pl.cdiv(rows, tb)
        ncores = max(1, min(_num_tensorcores(), n_blocks))
        tiles_per_core = pl.cdiv(n_blocks, ncores)
        last_block = n_blocks - 1
        acc_rows = 8 if tb % 8 == 0 else tb     # tb < 8 only for tiny inputs

        def in_map(c, i):
            # Clamp so a core never requests an out-of-range block; the kernel
            # masks that tile's contribution to zero (and the clamped duplicate
            # block index is unchanged, so its DMA is skipped).
            return (jnp.minimum(c * tiles_per_core + i, last_block), 0)

        kernel = functools.partial(
            _reduce_loss_kernel, squared=(loss_type == "mse"),
            rows=rows, tile_rows=tb, tiles_per_core=tiles_per_core)

        partials = pl.pallas_call(
            kernel,
            out_shape=jax.ShapeDtypeStruct((ncores, 8, 128), jnp.float32),
            grid_spec=pltpu.PrefetchScalarGridSpec(
                num_scalar_prefetch=0,
                grid=(ncores, tiles_per_core),
                in_specs=[pl.BlockSpec((tb, lanes), in_map),
                          pl.BlockSpec((tb, lanes), in_map)],
                out_specs=pl.BlockSpec((1, 8, 128), lambda c, i: (c, 0, 0)),
                scratch_shapes=[pltpu.VMEM((acc_rows, lanes), jnp.float32)],
            ),
            compiler_params=pltpu.CompilerParams(
                dimension_semantics=("parallel", "arbitrary"),
                vmem_limit_bytes=_VMEM_LIMIT_BYTES),
        )(x2, y2)
        total = jnp.sum(partials[:, 0, 0])       # one partial per TensorCore
        return total / jnp.float32(n_elem)

    # ---- cosine ----
    # torch.nn.CosineSimilarity default dim=1; for 2-D (B, D) inputs that is
    # the feature (last) axis, output shape (B,).
    # TODO(synk): cosine path only implements 2-D (B, D) inputs (dim=1 == last axis).
    assert x.ndim == 2, "cosine path implemented for 2-D (B, D) inputs"
    B, D = x.shape
    tb = _cosine_row_tile(B, D, x.dtype.itemsize)
    out = pl.pallas_call(
        _cosine_dir_kernel,
        out_shape=jax.ShapeDtypeStruct((1, B), jnp.float32),   # lane-dense output
        grid_spec=pltpu.PrefetchScalarGridSpec(
            num_scalar_prefetch=0,
            grid=(pl.cdiv(B, tb),),
            in_specs=[pl.BlockSpec((tb, D), lambda i: (i, 0)),
                      pl.BlockSpec((tb, D), lambda i: (i, 0))],
            out_specs=pl.BlockSpec((1, tb), lambda i: (0, i)),
        ),
        compiler_params=pltpu.CompilerParams(
            dimension_semantics=("parallel",),
            vmem_limit_bytes=_VMEM_LIMIT_BYTES),
    )(x, y)
    return out[0]


if __name__ == "__main__":
    key = jax.random.PRNGKey(0)

    def check(shape):
        kx, ky = jax.random.split(jax.random.fold_in(key, shape[0]))
        x = jax.random.normal(kx, shape, dtype=jnp.float32)
        y = jax.random.normal(ky, shape, dtype=jnp.float32)

        # min_pallas_bytes=0 forces the Pallas kernels at these small demo shapes.
        mse = jax.block_until_ready(direction_loss(x, y, "mse", min_pallas_bytes=0))
        mae = jax.block_until_ready(direction_loss(x, y, "mae", min_pallas_bytes=0))
        cos = jax.block_until_ready(direction_loss(x, y, "cosine", min_pallas_bytes=0))

        ref_mse = _reference_loss(x, y, "mse")
        ref_mae = _reference_loss(x, y, "mae")
        ref_cos = _reference_loss(x, y, "cosine")

        assert jnp.allclose(mse, ref_mse, rtol=1e-5, atol=1e-6), (shape, mse, ref_mse)
        assert jnp.allclose(mae, ref_mae, rtol=1e-5, atol=1e-6), (shape, mae, ref_mae)
        assert jnp.allclose(cos, ref_cos, rtol=1e-4, atol=1e-5), (shape, cos, ref_cos)

    # CLIP-style direction vectors: batch=8, dim=256.  The second shape
    # exercises ragged rows (not %8) and ragged lanes (not %128).
    check((8, 256))
    check((13, 300))

    print("KERNEL_OK")
</pallas_src>

<mosaic_0001>
module attributes {stable_mosaic.version = 11 : i64} {
  func.func @_reduce_loss_kernel(%arg0: i32, %arg1: i32, %arg2: memref<8x256xf32, #tpu.memory_space<vmem>>, %arg3: memref<8x256xf32, #tpu.memory_space<vmem>>, %arg4: memref<1x8x128xf32, #tpu.memory_space<vmem>>, %arg5: memref<8x256xf32, #tpu.memory_space<vmem>>) attributes {dimension_semantics = [#tpu.dimension_semantics<parallel>, #tpu.dimension_semantics<arbitrary>], iteration_bounds = array<i64: 1, 1>, scalar_prefetch = 0 : i64, scratch_operands = 1 : i64, tpu.core_type = #tpu.core_type<tc>, window_params = [{transform_indices = @transform_0, window_bounds = array<i64: 8, 256>}, {transform_indices = @transform_1, window_bounds = array<i64: 8, 256>}, {transform_indices = @transform_2, window_bounds = array<i64: 1, 8, 128>}]} {
    %c0_i32 = arith.constant 0 : i32
    %0 = arith.cmpi eq, %arg1, %c0_i32 : i32
    %1 = arith.extui %0 : i1 to i32
    %c0_i32_0 = arith.constant 0 : i32
    %2 = arith.cmpi ne, %1, %c0_i32_0 : i32
    scf.if %2 {
      %cst = arith.constant 0.000000e+00 : f32
      %20 = vector.broadcast %cst : f32 to vector<8x256xf32>
      %c0_11 = arith.constant 0 : index
      %c0_12 = arith.constant 0 : index
      %21 = vector.load %arg5[%c0_11, %c0_12] : memref<8x256xf32, #tpu.memory_space<vmem>>, vector<8x256xf32>
      tpu.vector_store %arg5[%c0_11, %c0_12], %20 {strides = array<i32>} : memref<8x256xf32, #tpu.memory_space<vmem>>, vector<8x256xf32>,
    } else {
    }
    %c0 = arith.constant 0 : index
    %c0_1 = arith.constant 0 : index
    %3 = vector.load %arg2[%c0, %c0_1] : memref<8x256xf32, #tpu.memory_space<vmem>>, vector<8x256xf32>
    %c0_2 = arith.constant 0 : index
    %c0_3 = arith.constant 0 : index
    %4 = vector.load %arg3[%c0_2, %c0_3] : memref<8x256xf32, #tpu.memory_space<vmem>>, vector<8x256xf32>
    %5 = arith.subf %3, %4 : vector<8x256xf32>
    %6 = arith.mulf %5, %5 : vector<8x256xf32>
    %c1_i32 = arith.constant 1 : i32
    %7 = arith.muli %arg0, %c1_i32 : i32
    %8 = arith.addi %7, %arg1 : i32
    %c8_i32 = arith.constant 8 : i32
    %9 = arith.muli %8, %c8_i32 : i32
    %c8_i32_4 = arith.constant 8 : i32
    %10 = arith.subi %c8_i32_4, %9 : i32
    %c8_i32_5 = arith.constant 8 : i32
    %11 = arith.cmpi sge, %10, %c8_i32_5 : i32
    %12 = arith.extui %11 : i1 to i32
    %c0_i32_6 = arith.constant 0 : i32
    %13 = arith.cmpi ne, %12, %c0_i32_6 : i32
    scf.if %13 {
      %c0_11 = arith.constant 0 : index
      %c0_12 = arith.constant 0 : index
      %20 = vector.load %arg5[%c0_11, %c0_12] : memref<8x256xf32, #tpu.memory_space<vmem>>, vector<8x256xf32>
      %21 = arith.addf %20, %6 : vector<8x256xf32>
      %c0_13 = arith.constant 0 : index
      %c0_14 = arith.constant 0 : index
      %22 = vector.load %arg5[%c0_13, %c0_14] : memref<8x256xf32, #tpu.memory_space<vmem>>, vector<8x256xf32>
      tpu.vector_store %arg5[%c0_13, %c0_14], %21 {strides = array<i32>} : memref<8x256xf32, #tpu.memory_space<vmem>>, vector<8x256xf32>,
    } else {
    }
    %c8_i32_7 = arith.constant 8 : i32
    %14 = arith.cmpi slt, %10, %c8_i32_7 : i32
    %15 = arith.extui %14 : i1 to i32
    %c0_i32_8 = arith.constant 0 : i32
    %16 = arith.cmpi ne, %15, %c0_i32_8 : i32
    scf.if %16 {
      %20 = tpu.iota {dimensions = array<i32: 0>} : vector<8x256xi32>
      %c0_11 = arith.constant 0 : index
      %c0_12 = arith.constant 0 : index
      %21 = vector.load %arg5[%c0_11, %c0_12] : memref<8x256xf32, #tpu.memory_space<vmem>>, vector<8x256xf32>
      %22 = vector.broadcast %10 : i32 to vector<8x256xi32>
      %23 = arith.cmpi slt, %20, %22 : vector<8x256xi32>
      %cst = arith.constant 0.000000e+00 : f32
      %24 = vector.broadcast %cst : f32 to vector<8x256xf32>
      %25 = arith.select %23, %6, %24 : vector<8x256xi1>, vector<8x256xf32>
      %26 = arith.addf %21, %25 : vector<8x256xf32>
      %c0_13 = arith.constant 0 : index
      %c0_14 = arith.constant 0 : index
      %27 = vector.load %arg5[%c0_13, %c0_14] : memref<8x256xf32, #tpu.memory_space<vmem>>, vector<8x256xf32>
      tpu.vector_store %arg5[%c0_13, %c0_14], %26 {strides = array<i32>} : memref<8x256xf32, #tpu.memory_space<vmem>>, vector<8x256xf32>,
    } else {
    }
    %c0_i32_9 = arith.constant 0 : i32
    %17 = arith.cmpi eq, %arg1, %c0_i32_9 : i32
    %18 = arith.extui %17 : i1 to i32
    %c0_i32_10 = arith.constant 0 : i32
    %19 = arith.cmpi ne, %18, %c0_i32_10 : i32
    scf.if %19 {
      %c0_11 = arith.constant 0 : index
      %c0_12 = arith.constant 0 : index
      %20 = vector.load %arg5[%c0_11, %c0_12] : memref<8x256xf32, #tpu.memory_space<vmem>>, vector<8x256xf32>
      %21 = vector.shape_cast %20 : vector<8x256xf32> to vector<1x8x256xf32>
      %cst = arith.constant dense<0.000000e+00> : vector<1xf32>
      %22 = vector.multi_reduction <add>, %21, %cst [1, 2] : vector<1x8x256xf32> to vector<1xf32>
      %23 = vector.shape_cast %22 : vector<1xf32> to vector<1x1x1xf32>
      %24 = vector.extract %23[0, 0, 0] : f32 from vector<1x1x1xf32>
      %25 = vector.broadcast %24 : f32 to vector<1x8x128xf32>
      %c0_13 = arith.constant 0 : index
      %c0_14 = arith.constant 0 : index
      %c0_15 = arith.constant 0 : index
      %26 = vector.load %arg4[%c0_13, %c0_14, %c0_15] : memref<1x8x128xf32, #tpu.memory_space<vmem>>, vector<1x8x128xf32>
      tpu.vector_store %arg4[%c0_13, %c0_14, %c0_15], %25 {strides = array<i32>} : memref<1x8x128xf32, #tpu.memory_space<vmem>>, vector<1x8x128xf32>,
    } else {
    }
    return
  }
  func.func @transform_0(%arg0: i32, %arg1: i32) -> (i32, i32) {
    %c1_i32 = arith.constant 1 : i32
    %0 = arith.muli %arg0, %c1_i32 : i32
    %1 = arith.addi %0, %arg1 : i32
    %c0_i32 = arith.constant 0 : i32
    %2 = arith.minsi %1, %c0_i32 : i32
    %c0_i32_0 = arith.constant 0 : i32
    %c0_i32_1 = arith.constant 0 : i32
    return %2, %c0_i32_0 : i32, i32
  }
  func.func @transform_1(%arg0: i32, %arg1: i32) -> (i32, i32) {
    %c1_i32 = arith.constant 1 : i32
    %0 = arith.muli %arg0, %c1_i32 : i32
    %1 = arith.addi %0, %arg1 : i32
    %c0_i32 = arith.constant 0 : i32
    %2 = arith.minsi %1, %c0_i32 : i32
    %c0_i32_0 = arith.constant 0 : i32
    %c0_i32_1 = arith.constant 0 : i32
    return %2, %c0_i32_0 : i32, i32
  }
  func.func @transform_2(%arg0: i32, %arg1: i32) -> (i32, i32, i32) {
    %c0_i32 = arith.constant 0 : i32
    %c0_i32_0 = arith.constant 0 : i32
    %c0_i32_1 = arith.constant 0 : i32
    return %arg0, %c0_i32, %c0_i32_0 : i32, i32, i32
  }
}

</mosaic_0001>

<bundles_post_ra>
// kernel: tpu_custom_call.1
= control target key start
LH: loop header
LB: loop body
LE: loop exit
PB: predicated region body
PF: predicated region fallthrough
CT: control target
= control target key end

     0   :  { %7 = vsyncpa [#allocation4], 0  ;;  %s265_s0 = inlined_call_operand.hbm [shape: f32[8,256], index: 0, kind: input, shape index: {}]   ;;  %s266_s1 = inlined_call_operand.hbm [shape: f32[8,256], index: 1, kind: input, shape index: {}]   ;;  %s267_s2 = inlined_call_operand.hbm [shape: f32[1,8,128], index: 2, kind: output, shape index: {}]  }
   0x1   :  { %8 = vsyncpa [#allocation7], 0 }
   0x2   :  { %9 = vsyncpa [#allocation5], 0  ;;  %s211_s9 = smov [#allocation3]   ;;  %s212_s11 = smov [#allocation6]  }
   0x3   :  { %s22_s10 = sshll.u32 %s211_s9, 4  ;;  %s38_s12 = sshll.u32 %s212_s11, 4  ;;  %s23_s10 = int_to_ptr.vmem [resolvable:$true] %s22_s10  ;;  %s39_s12 = int_to_ptr.vmem [resolvable:$true] %s38_s12 }
   0x4   :  { %s139_s15 = scalar_lea.hbm %s265_s0, 256 }
   0x5   :  { %p140_p0 = scmp.ne.s32.totalorder %s265_s0, %s139_s15  ;;  %p143_p1 = scmp.lt.u32.totalorder %s139_s15, %s265_s0 }
   0x7   :  { %p145_p2 = pnand %p143_p1, %p140_p0 }
   0x9   :  { %148 = shalt.err (!%p145_p2)
}
   0xa   :  { %s149_s20 = scalar_lea.vmem %s23_s10, 256  ;;  %p154_p4 = scmp.lt.s32.totalorder %s23_s10, %s23_s10 }
   0xb   :  { %p150_p3 = scmp.ne.s32.totalorder %s23_s10, %s149_s20  ;;  %p155_p5 = scmp.lt.s32.totalorder %s149_s20, %s149_s20 }
   0xd   :  { %p156_p6 = por %p155_p5, %p154_p4 }
   0xf   :  { %p157_p7 = pnand %p156_p6, %p150_p3 }
  0x11   :  { %160 = shalt.err (!%p157_p7)
}
  0x12   :  { %25 = dma.hbm_to_vmem [thread:$0]  %s265_s0, 256, %s23_s10, [#allocation4]  }
  0x13   :  { %s161_s25 = scalar_lea.hbm %s266_s1, 256 }
  0x14   :  { %p162_p8 = scmp.ne.s32.totalorder %s266_s1, %s161_s25  ;;  %p165_p9 = scmp.lt.u32.totalorder %s161_s25, %s266_s1 }
  0x16   :  { %p167_p10 = pnand %p165_p9, %p162_p8 }
  0x18   :  { %170 = shalt.err (!%p167_p10)
}
  0x19   :  { %s171_s30 = scalar_lea.vmem %s39_s12, 256  ;;  %p176_p12 = scmp.lt.s32.totalorder %s39_s12, %s39_s12 }
  0x1a   :  { %p172_p11 = scmp.ne.s32.totalorder %s39_s12, %s171_s30  ;;  %p177_p13 = scmp.lt.s32.totalorder %s171_s30, %s171_s30 }
  0x1c   :  { %p178_p0 = por %p177_p13, %p176_p12 }
  0x1e   :  { %p179_p1 = pnand %p178_p0, %p172_p11 }
  0x20   :  { %182 = shalt.err (!%p179_p1)
}
  0x21   :  { %41 = dma.hbm_to_vmem [thread:$0]  %s266_s1, 256, %s39_s12, [#allocation7]  }
  0x22   :  { %205 = dma.done.wait [#allocation4], 256  }
  0x23   :  { %206 = vsyncadd [#allocation4], 4294967040 }
  0x24   :  { %207 = dma.done.wait [#allocation7], 256  }
  0x25   :  { %208 = vsyncadd [#allocation7], 4294967040  ;;  %v60_v0 = vld [vmem:[#allocation3] sm:$0xff]  ;;  %v61_v1 = vld [vmem:[#allocation3 + $0x8] sm:$0xff]  ;;  %s213_s1 = smov [#allocation8]  }
  0x26   :  { %v62_v2 = vld [vmem:[#allocation6] sm:$0xff]  ;;  %v63_v3 = vld [vmem:[#allocation6 + $0x8] sm:$0xff]  ;;  %s120_s4 = sshll.u32 %s213_s1, 4  ;;  %s121_s4 = int_to_ptr.vmem [resolvable:$true] %s120_s4 }
  0x27   :  { %v64_v4 = vsub.f32 %v60_v0, %v62_v2  ;;  %v65_v5 = vsub.f32 %v61_v1, %v63_v3  ;;  %s183_s6 = scalar_lea.vmem %s121_s4, 128  ;;  %p188_p3 = scmp.lt.s32.totalorder %s121_s4, %s121_s4 }
  0x28   :  { %p184_p2 = scmp.ne.s32.totalorder %s121_s4, %s183_s6  ;;  %p189_p4 = scmp.lt.s32.totalorder %s183_s6, %s183_s6 }
  0x29   :  { %v66_v6 = vmul.f32 %v64_v4, %v64_v4  ;;  %v67_v7 = vmul.f32 %v65_v5, %v65_v5 }
  0x2a   :  { %p190_p5 = por %p189_p4, %p188_p3 }
  0x2b   :  { %v102_v8 = vadd.f32 %v67_v7, %v66_v6 }
  0x2c   :  { %p191_p6 = pnand %p190_p5, %p184_p2 }
  0x2d   :  { %103 = vadd.xlane.f32.xlu0 %v102_v8 }
  0xba   :  { %v104_v9 = vpop.xlane.xlu0 %103 }
  0xbb   :  { %v105_v10 = vrot.slane %v104_v9, 4 }
  0xbd   :  { %v106_v11 = vadd.f32 %v105_v10, %v104_v9 }
  0xbf   :  { %v107_v12 = vrot.slane %v106_v11, 2 }
  0xc1   :  { %v108_v13 = vadd.f32 %v107_v12, %v106_v11 }
  0xc3   :  { %v109_v14 = vrot.slane %v108_v13, 1 }
  0xc5   :  { %v110_v15 = vadd.f32 %v109_v14, %v108_v13 }
  0xc7   :  { %134 = vpush %v110_v15 }
  0xf8   :  { %s135_s5 = spop %134 }
  0xf9   :  { %v112_v16 = vstv %s135_s5 }
  0xfa   :  { %113 = vst [vmem:[#allocation8] sm:$0xff] %v112_v16 }
  0xfb   :  { %194 = shalt.err (!%p191_p6)
}
  0xfc   :  { %s195_s9 = scalar_lea.hbm %s267_s2, 128 }
  0xfd   :  { %p196_p7 = scmp.ne.s32.totalorder %s267_s2, %s195_s9  ;;  %p199_p8 = scmp.lt.u32.totalorder %s195_s9, %s267_s2 }
  0xff   :  { %p201_p9 = pnand %p199_p8, %p196_p7 }
 0x101   :  { %204 = shalt.err (!%p201_p9)
}
 0x102   :  { %123 = dma.vmem_to_hbm [thread:$0]  %s121_s4, 128, %s267_s2, [#allocation5]  }
 0x103   :  { %209 = dma.done.wait [#allocation5], 128  }
 0x104   :  { %210 = vsyncadd [#allocation5], 4294967168 }
 0x105   :  { %127 = vsyncpa [#allocation4], 1 }
 0x106   :  { %128 = vsyncpa [#allocation7], 1 }
 0x107   :  { %129 = vsyncpa [#allocation5], 1 }

</bundles_post_ra>
